<compile_context>
chip_gen: v7x
topology: tpu7x:2x2x1
jax: 0.10.0
libtpu: 0.0.40
codegen_flags: <defaults>
</compile_context>

<pallas_src>
import jax
import jax.numpy as jnp
from jax.experimental import pallas as pl
from jax.experimental.pallas import tpu as pltpu


def _round_up(x, m):
    return ((x + m - 1) // m) * m


def _mlp_kernel_single(x_ref, w1_ref, w2_ref, o_ref):
    """Hidden dim fits in one tile: no accumulator, direct write."""
    h = jnp.dot(x_ref[...], w1_ref[...], preferred_element_type=jnp.float32)
    h = jnp.maximum(h, 0.0)
    o_ref[...] = jnp.dot(h.astype(w2_ref.dtype), w2_ref[...],
                         preferred_element_type=jnp.float32).astype(o_ref.dtype)


def _mlp_kernel_streamed(x_ref, w1_ref, w2_ref, o_ref, acc_ref):
    """Hidden dim streamed over grid axis 1 with an f32 VMEM accumulator."""
    h_idx = pl.program_id(1)

    @pl.when(h_idx == 0)
    def _init():
        acc_ref[...] = jnp.zeros_like(acc_ref)

    # fc1 block: (tm, Dp) @ (Dp, th) -> f32 on the MXU.
    h = jnp.dot(x_ref[...], w1_ref[...], preferred_element_type=jnp.float32)
    # ReLU is elementwise per hidden unit, so block-wise
    # relu(x @ W1[:, h]) @ W2[h, :] accumulation is exact.
    h = jnp.maximum(h, 0.0)
    # fc2 block: (tm, th) @ (th, Dp), accumulated in f32 scratch.
    acc_ref[...] += jnp.dot(h.astype(w2_ref.dtype), w2_ref[...],
                            preferred_element_type=jnp.float32)

    @pl.when(h_idx == pl.num_programs(1) - 1)
    def _finalize():
        o_ref[...] = acc_ref[...].astype(o_ref.dtype)


def parallel_mlp(x, w1, w2, *, tile_tokens=256, tile_hidden=512,
                 compute_dtype=jnp.bfloat16):
    """Fused relu(x @ w1) @ w2.

    x:  [T, D]  activations (tokens-major)
    w1: [D, H]  fc1 weight, stored [in, out] (transposed vs nn.Linear)
    w2: [H, D]  fc2 weight, stored [in, out]
    returns [T, D] in x.dtype.
    """
    T, D = x.shape
    Dw, H = w1.shape
    assert Dw == D and w2.shape == (H, D)
    out_dtype = x.dtype

    # Lane-dense last dims: pad the model dim to a multiple of 128.
    Dp = _round_up(max(D, 128), 128)
    # Token tile: multiple of 8 sublanes, never larger than the padded problem
    # (toy shapes collapse to a single grid step).
    tm = min(tile_tokens, _round_up(T, 8))
    Tp = _round_up(T, tm)
    # Hidden tile: multiple of 128, never larger than the padded problem.
    th = min(tile_hidden, _round_up(H, 128))
    Hp = _round_up(H, th)
    n_h = Hp // th

    # Cast to bf16 MXU operands (halves weight HBM/VMEM traffic) and zero-pad.
    # Zero padding is exact: padded rows/cols contribute 0 through both matmuls
    # (relu(0) == 0) and padded output rows/cols are sliced off below.
    xc = jnp.pad(x.astype(compute_dtype), ((0, Tp - T), (0, Dp - D)))
    w1c = jnp.pad(w1.astype(compute_dtype), ((0, Dp - D), (0, Hp - H)))
    w2c = jnp.pad(w2.astype(compute_dtype), ((0, Hp - H), (0, Dp - D)))

    grid = (Tp // tm, n_h)  # token axis (parallel) first, hidden last.

    in_bytes = jnp.dtype(compute_dtype).itemsize
    out_bytes = jnp.dtype(out_dtype).itemsize
    cost = pl.CostEstimate(
        flops=4 * Tp * Dp * Hp,          # two matmuls, 2*T*D*H each
        transcendentals=0,
        bytes_accessed=(Tp * Dp + Dp * Hp + Hp * Dp) * in_bytes + Tp * Dp * out_bytes,
    )

    # Double-buffered x / W1 / W2 / out tiles + the f32 accumulator.
    vmem_needed = (2 * (tm * Dp + Dp * th + th * Dp) * in_bytes
                   + 2 * tm * Dp * out_bytes
                   + tm * Dp * 4)
    vmem_limit = int(max(vmem_needed + (4 << 20), 32 << 20))

    if n_h == 1:
        kernel = _mlp_kernel_single
        scratch_shapes = []
    else:
        kernel = _mlp_kernel_streamed
        scratch_shapes = [pltpu.VMEM((tm, Dp), jnp.float32)]

    out = pl.pallas_call(
        kernel,
        out_shape=jax.ShapeDtypeStruct((Tp, Dp), out_dtype),
        grid_spec=pltpu.PrefetchScalarGridSpec(
            num_scalar_prefetch=0,
            grid=grid,
            in_specs=[
                pl.BlockSpec((tm, Dp), lambda i, h: (i, 0)),   # x token tile
                pl.BlockSpec((Dp, th), lambda i, h: (0, h)),   # W1 column block
                pl.BlockSpec((th, Dp), lambda i, h: (h, 0)),   # W2 row block
            ],
            out_specs=pl.BlockSpec((tm, Dp), lambda i, h: (i, 0)),
            scratch_shapes=scratch_shapes,
        ),
        compiler_params=pltpu.CompilerParams(
            dimension_semantics=("parallel", "arbitrary"),
            vmem_limit_bytes=vmem_limit,
        ),
        cost_estimate=cost,
    )(xc, w1c, w2c)

    return out[:T, :D]


if __name__ == "__main__":
    # config: model_dim=32, mlp_expansion_scale=4 -> hidden_dim=128,
    #         bias=False in both Linears, dtype=float32, tp_size=1.
    batch, seq, model_dim, expansion = 2, 8, 32, 4
    hidden_dim = model_dim * expansion  # 128

    key = jax.random.PRNGKey(0)
    kx, k1, k2 = jax.random.split(key, 3)

    x = jax.random.normal(kx, (batch, seq, model_dim), dtype=jnp.float32)
    # Deterministic weight init (stand-in for nn.Linear's kaiming-uniform),
    # stored [in, out].
    w1 = jax.random.normal(k1, (model_dim, hidden_dim), dtype=jnp.float32) * (
        1.0 / jnp.sqrt(model_dim))
    w2 = jax.random.normal(k2, (hidden_dim, model_dim), dtype=jnp.float32) * (
        1.0 / jnp.sqrt(hidden_dim))

    x2d = x.reshape(batch * seq, model_dim)
    out = parallel_mlp(x2d, w1, w2)
    out = jax.block_until_ready(out).reshape(batch, seq, model_dim)

    # Reference in plain f32 JAX (same math as the PyTorch forward).
    # Kernel uses bf16 MXU operands with f32 accumulation -> loosened tolerance.
    ref = (jnp.maximum(x2d @ w1, 0.0) @ w2).reshape(batch, seq, model_dim)
    assert jnp.allclose(out, ref, atol=5e-2, rtol=5e-2), "mismatch vs reference"

    print("KERNEL_OK")
</pallas_src>

<mosaic_0001>
module attributes {stable_mosaic.version = 11 : i64} {
  func.func @_mlp_kernel_single(%arg0: i32, %arg1: i32, %arg2: memref<16x128xbf16, #tpu.memory_space<vmem>>, %arg3: memref<128x128xbf16, #tpu.memory_space<vmem>>, %arg4: memref<128x128xbf16, #tpu.memory_space<vmem>>, %arg5: memref<16x128xf32, #tpu.memory_space<vmem>>) attributes {dimension_semantics = [#tpu.dimension_semantics<parallel>, #tpu.dimension_semantics<arbitrary>], iteration_bounds = array<i64: 1, 1>, scalar_prefetch = 0 : i64, scratch_operands = 0 : i64, tpu.core_type = #tpu.core_type<tc>, window_params = [{transform_indices = @transform_0, window_bounds = array<i64: 16, 128>}, {transform_indices = @transform_1, window_bounds = array<i64: 128, 128>}, {transform_indices = @transform_2, window_bounds = array<i64: 128, 128>}, {transform_indices = @transform_3, window_bounds = array<i64: 16, 128>}]} {
    %c0 = arith.constant 0 : index
    %c0_0 = arith.constant 0 : index
    %0 = vector.load %arg2[%c0, %c0_0] : memref<16x128xbf16, #tpu.memory_space<vmem>>, vector<16x128xbf16>
    %c0_1 = arith.constant 0 : index
    %c0_2 = arith.constant 0 : index
    %1 = vector.load %arg3[%c0_1, %c0_2] : memref<128x128xbf16, #tpu.memory_space<vmem>>, vector<128x128xbf16>
    %cst = arith.constant dense<0.000000e+00> : vector<16x128xf32>
    %2 = tpu.matmul %0, %1, %cst {dimension_numbers = #tpu.dot_dimension_numbers<[1], [0], [0], [1], [0, 0, 1, 1], [], []>} : vector<16x128xbf16>, vector<128x128xbf16>, vector<16x128xf32> -> vector<16x128xf32>
    %cst_3 = arith.constant 0.000000e+00 : f32
    %3 = vector.broadcast %cst_3 : f32 to vector<16x128xf32>
    %4 = arith.maximumf %2, %3 : vector<16x128xf32>
    %5 = arith.truncf %4 : vector<16x128xf32> to vector<16x128xbf16>
    %c0_4 = arith.constant 0 : index
    %c0_5 = arith.constant 0 : index
    %6 = vector.load %arg4[%c0_4, %c0_5] : memref<128x128xbf16, #tpu.memory_space<vmem>>, vector<128x128xbf16>
    %cst_6 = arith.constant dense<0.000000e+00> : vector<16x128xf32>
    %7 = tpu.matmul %5, %6, %cst_6 {dimension_numbers = #tpu.dot_dimension_numbers<[1], [0], [0], [1], [0, 0, 1, 1], [], []>} : vector<16x128xbf16>, vector<128x128xbf16>, vector<16x128xf32> -> vector<16x128xf32>
    %c0_7 = arith.constant 0 : index
    %c0_8 = arith.constant 0 : index
    %8 = vector.load %arg5[%c0_7, %c0_8] : memref<16x128xf32, #tpu.memory_space<vmem>>, vector<16x128xf32>
    tpu.vector_store %arg5[%c0_7, %c0_8], %7 {strides = array<i32>} : memref<16x128xf32, #tpu.memory_space<vmem>>, vector<16x128xf32>,
    return
  }
  func.func @transform_0(%arg0: i32, %arg1: i32) -> (i32, i32) {
    %c0_i32 = arith.constant 0 : i32
    %c0_i32_0 = arith.constant 0 : i32
    return %arg0, %c0_i32 : i32, i32
  }
  func.func @transform_1(%arg0: i32, %arg1: i32) -> (i32, i32) {
    %c0_i32 = arith.constant 0 : i32
    %c0_i32_0 = arith.constant 0 : i32
    return %c0_i32, %arg1 : i32, i32
  }
  func.func @transform_2(%arg0: i32, %arg1: i32) -> (i32, i32) {
    %c0_i32 = arith.constant 0 : i32
    %c0_i32_0 = arith.constant 0 : i32
    return %arg1, %c0_i32 : i32, i32
  }
  func.func @transform_3(%arg0: i32, %arg1: i32) -> (i32, i32) {
    %c0_i32 = arith.constant 0 : i32
    %c0_i32_0 = arith.constant 0 : i32
    return %arg0, %c0_i32 : i32, i32
  }
}

</mosaic_0001>

<bundles_post_ra>
// kernel: tpu_custom_call.1
= control target key start
LH: loop header
LB: loop body
LE: loop exit
PB: predicated region body
PF: predicated region fallthrough
CT: control target
= control target key end

     0   :  { %8 = vsyncpa [#allocation3], 0  ;;  %s588_s0 = inlined_call_operand.hbm [shape: bf16[16,128], index: 0, kind: input, shape index: {}]   ;;  %s589_s1 = inlined_call_operand.hbm [shape: bf16[128,128], index: 1, kind: input, shape index: {}]   ;;  %s590_s2 = inlined_call_operand.hbm [shape: bf16[128,128], index: 2, kind: input, shape index: {}]   ;;  %s591_s3 = inlined_call_operand.hbm [shape: f32[16,128], index: 3, kind: output, shape index: {}]  }
   0x1   :  { %9 = vsyncpa [#allocation6], 0 }
   0x2   :  { %10 = vsyncpa [#allocation4], 0  ;;  %s494_s12 = smov [#allocation5]   ;;  %s495_s14 = smov [#allocation2]  }
   0x3   :  { %s28_s13 = sshll.u32 %s494_s12, 4  ;;  %s16_s15 = sshll.u32 %s495_s14, 4  ;;  %s29_s13 = int_to_ptr.vmem [resolvable:$true] %s28_s13  ;;  %s524_s15 = int_to_ptr.vmem [resolvable:$true] %s16_s15 }
   0x4   :  { %s400_s18 = scalar_lea.hbm %s589_s1, 1024 }
   0x5   :  { %p401_p0 = scmp.ne.s32.totalorder %s589_s1, %s400_s18  ;;  %p404_p1 = scmp.lt.u32.totalorder %s400_s18, %s589_s1 }
   0x7   :  { %p406_p2 = pnand %p404_p1, %p401_p0 }
   0x9   :  { %409 = shalt.err (!%p406_p2)
}
   0xa   :  { %s410_s23 = scalar_lea.vmem %s29_s13, 1024  ;;  %p415_p4 = scmp.lt.s32.totalorder %s29_s13, %s29_s13 }
   0xb   :  { %p411_p3 = scmp.ne.s32.totalorder %s29_s13, %s410_s23  ;;  %p416_p5 = scmp.lt.s32.totalorder %s410_s23, %s410_s23 }
   0xd   :  { %p417_p6 = por %p416_p5, %p415_p4 }
   0xf   :  { %p418_p7 = pnand %p417_p6, %p411_p3 }
  0x11   :  { %421 = shalt.err (!%p418_p7)
}
  0x12   :  { %s496_s24 = smov 64   ;;  %s497_s25 = smov 4  }
  0x13   :  { %34 = dma.hbm_to_vmem [thread:$0]  %s589_s1, 1024, %s29_s13, [#allocation6], %s496_s24, %s496_s24, %s497_s25  }
  0x14   :  { %s422_s30 = scalar_lea.hbm %s588_s0, 128 }
  0x15   :  { %p423_p8 = scmp.ne.s32.totalorder %s588_s0, %s422_s30  ;;  %p426_p9 = scmp.lt.u32.totalorder %s422_s30, %s588_s0 }
  0x17   :  { %p428_p10 = pnand %p426_p9, %p423_p8 }
  0x19   :  { %431 = shalt.err (!%p428_p10)
}
  0x1a   :  { %s432_s8 = scalar_lea.vmem %s524_s15, 128  ;;  %p437_p12 = scmp.lt.s32.totalorder %s524_s15, %s524_s15 }
  0x1b   :  { %p433_p11 = scmp.ne.s32.totalorder %s524_s15, %s432_s8  ;;  %p438_p13 = scmp.lt.s32.totalorder %s432_s8, %s432_s8 }
  0x1d   :  { %p439_p0 = por %p438_p13, %p437_p12 }
  0x1f   :  { %p440_p1 = pnand %p439_p0, %p433_p11 }
  0x21   :  { %443 = shalt.err (!%p440_p1)
}
  0x22   :  { %22 = dma.hbm_to_vmem [thread:$0]  %s588_s0, 128, %s524_s15, [#allocation3], %s496_s24, %s496_s24, %s497_s25  }
  0x23   :  { %s498_s10 = smov [#allocation7]   ;;  %s444_s14 = scalar_lea.hbm %s590_s2, 1024 }
  0x24   :  { %s40_s11 = sshll.u32 %s498_s10, 4  ;;  %p445_p2 = scmp.ne.s32.totalorder %s590_s2, %s444_s14  ;;  %s41_s11 = int_to_ptr.vmem [resolvable:$true] %s40_s11 }
  0x25   :  { %p448_p3 = scmp.lt.u32.totalorder %s444_s14, %s590_s2 }
  0x27   :  { %p450_p4 = pnand %p448_p3, %p445_p2 }
  0x29   :  { %453 = shalt.err (!%p450_p4)
}
  0x2a   :  { %s454_s20 = scalar_lea.vmem %s41_s11, 1024  ;;  %p459_p6 = scmp.lt.s32.totalorder %s41_s11, %s41_s11 }
  0x2b   :  { %p455_p5 = scmp.ne.s32.totalorder %s41_s11, %s454_s20  ;;  %p460_p7 = scmp.lt.s32.totalorder %s454_s20, %s454_s20 }
  0x2d   :  { %p461_p8 = por %p460_p7, %p459_p6 }
  0x2f   :  { %p462_p9 = pnand %p461_p8, %p455_p5 }
  0x31   :  { %465 = shalt.err (!%p462_p9)
}
  0x32   :  { %46 = dma.hbm_to_vmem [thread:$0]  %s590_s2, 1024, %s41_s11, [#allocation6], %s496_s24, %s496_s24, %s497_s25  }
  0x33   :  { %488 = dma.done.wait [#allocation3], 128  }
  0x34   :  { %489 = vsyncadd [#allocation3], 4294967168 }
  0x35   :  { %490 = dma.done.wait [#allocation6], 2048  }
  0x36   :  { %491 = vsyncadd [#allocation6], 4294965248  ;;  %v499_v0 = vmov 0.0   ;;  %vm500_vm0 = vmmov 0   ;;  %v383_v1 = vld [vmem:[#allocation5] sm:$0xff]   ;;  %v384_v2 = vld [vmem:[#allocation5 + $0x8] sm:$0xff]  }
  0x37   :  { %333 = vmatprep.subr.bf16.mxu0 %v499_v0  ;;  %349 = vmatprep.mubr.msk.bf16.mxu0 %vm500_vm0, %v499_v0  ;;  %v385_v3 = vld [vmem:[#allocation5 + $0x10] sm:$0xff]   ;;  %v392_v4 = vld [vmem:[#allocation7] sm:$0xff]   ;;  %v386_v5 = vld [vmem:[#allocation5 + $0x18] sm:$0xff]   ;;  %s501_s2 = smov [#allocation8]  }
  0x38   :  { %353 = vmatprep.subr.bf16.mxu1 %v499_v0  ;;  %369 = vmatprep.mubr.msk.bf16.mxu1 %vm500_vm0, %v499_v0  ;;  %v393_v6 = vld [vmem:[#allocation7 + $0x8] sm:$0xff]   ;;  %v387_v7 = vld [vmem:[#allocation5 + $0x20] sm:$0xff]   ;;  %v394_v8 = vld [vmem:[#allocation7 + $0x10] sm:$0xff]   ;;  %s285_s21 = sshll.u32 %s501_s2, 4  ;;  %s286_s21 = int_to_ptr.vmem [resolvable:$true] %s285_s21 }
  0x39   :  { %334 = vmatpush3.bf16.msra.mxu0 %v383_v1  ;;  %354 = vmatpush3.bf16.msra.mxu1 %v392_v4  ;;  %v388_v9 = vld [vmem:[#allocation5 + $0x28] sm:$0xff]   ;;  %v395_v10 = vld [vmem:[#allocation7 + $0x18] sm:$0xff]   ;;  %v389_v11 = vld [vmem:[#allocation5 + $0x30] sm:$0xff]   ;;  %s466_s22 = scalar_lea.vmem %s286_s21, 256  ;;  %p471_p11 = scmp.lt.s32.totalorder %s286_s21, %s286_s21 }
  0x3a   :  { %335 = vmatprep.subr.bf16.mxu0 %v499_v0  ;;  %355 = vmatprep.subr.bf16.mxu1 %v499_v0  ;;  %v396_v12 = vld [vmem:[#allocation7 + $0x20] sm:$0xff]   ;;  %v390_v13 = vld [vmem:[#allocation5 + $0x38] sm:$0xff]   ;;  %v397_v14 = vld [vmem:[#allocation7 + $0x28] sm:$0xff]   ;;  %p467_p10 = scmp.ne.s32.totalorder %s286_s21, %s466_s22  ;;  %p472_p12 = scmp.lt.s32.totalorder %s466_s22, %s466_s22 }
  0x3b   :  { %v391_v15 = vld [vmem:[#allocation2] sm:$0xff]   ;;  %v398_v16 = vld [vmem:[#allocation7 + $0x30] sm:$0xff]  }
  0x3c   :  { %v399_v17 = vld [vmem:[#allocation7 + $0x38] sm:$0xff]   ;;  %p473_p13 = por %p472_p12, %p471_p11 }
  0x3d   :  { %336 = vmatpush3.bf16.msra.mxu0 %v384_v2  ;;  %356 = vmatpush3.bf16.msra.mxu1 %v393_v6 }
  0x3e   :  { %337 = vmatprep.subr.bf16.mxu0 %v499_v0  ;;  %357 = vmatprep.subr.bf16.mxu1 %v499_v0  ;;  %p474_p0 = pnand %p473_p13, %p467_p10 }
  0x41   :  { %338 = vmatpush3.bf16.msra.mxu0 %v385_v3  ;;  %358 = vmatpush3.bf16.msra.mxu1 %v394_v8 }
  0x42   :  { %339 = vmatprep.subr.bf16.mxu0 %v499_v0  ;;  %359 = vmatprep.subr.bf16.mxu1 %v499_v0 }
  0x45   :  { %340 = vmatpush3.bf16.msra.mxu0 %v386_v5  ;;  %360 = vmatpush3.bf16.msra.mxu1 %v395_v10 }
  0x46   :  { %341 = vmatprep.subr.bf16.mxu0 %v499_v0  ;;  %361 = vmatprep.subr.bf16.mxu1 %v499_v0 }
  0x49   :  { %342 = vmatpush3.bf16.msra.mxu0 %v387_v7  ;;  %362 = vmatpush3.bf16.msra.mxu1 %v396_v12 }
  0x4a   :  { %343 = vmatprep.subr.bf16.mxu0 %v499_v0  ;;  %363 = vmatprep.subr.bf16.mxu1 %v499_v0 }
  0x4d   :  { %344 = vmatpush3.bf16.msra.mxu0 %v388_v9  ;;  %364 = vmatpush3.bf16.msra.mxu1 %v397_v14 }
  0x4e   :  { %345 = vmatprep.subr.bf16.mxu0 %v499_v0  ;;  %365 = vmatprep.subr.bf16.mxu1 %v499_v0 }
  0x51   :  { %346 = vmatpush3.bf16.msra.mxu0 %v389_v11  ;;  %366 = vmatpush3.bf16.msra.mxu1 %v398_v16 }
  0x52   :  { %347 = vmatprep.subr.bf16.mxu0 %v499_v0  ;;  %367 = vmatprep.subr.bf16.mxu1 %v499_v0 }
  0x55   :  { %348 = vmatpush3.bf16.msra.mxu0 %v390_v13  ;;  %368 = vmatpush3.bf16.msra.mxu1 %v399_v17 }
  0x58   :  { %350 = vmatmul.mubr.bf16.vlgmr.msra.gmra.mrb[0].mxu0 %v391_v15 }
 0x12b   :  { %v163_v18 = vpop.f32.mrb[0].mxu0 }
 0x12c   :  { %v351_v19 = vpop.f32.mrb[1].mxu0  ;;  %v170_v21 = vmax.f32 %v163_v18, 0.0 }
 0x12d   :  { %v166_v20 = vpop.f32.mrb[2].mxu0 }
 0x12e   :  { %v171_v22 = vmax.f32 %v166_v20, 0.0  ;;  %v352_v23 = vpop.f32.mrb[3].mxu0 }
 0x130   :  { %v172_v24 = vpack.c.bf16 %v171_v22, %v170_v21 }
 0x132   :  { %370 = vmatmul.mubr.bf16.vlgmr.msra.gmra.mrb[0].mxu1 %v172_v24 }
 0x205   :  { %v271_v25 = vpop.f32.mrb[0].mxu1 }
 0x206   :  { %278 = vst [vmem:[#allocation8] sm:$0xff] %v271_v25  ;;  %v371_v26 = vpop.f32.mrb[1].mxu1 }
 0x207   :  { %v274_v27 = vpop.f32.mrb[2].mxu1 }
 0x208   :  { %279 = vst [vmem:[#allocation8 + $0x8] sm:$0xff] %v274_v27  ;;  %v372_v28 = vpop.f32.mrb[3].mxu1 }
 0x209   :  { %477 = shalt.err (!%p474_p0)
}
 0x20a   :  { %s478_s25 = scalar_lea.hbm %s591_s3, 256 }
 0x20b   :  { %p479_p1 = scmp.ne.s32.totalorder %s591_s3, %s478_s25  ;;  %p482_p2 = scmp.lt.u32.totalorder %s478_s25, %s591_s3 }
 0x20d   :  { %p484_p3 = pnand %p482_p2, %p479_p1 }
 0x20f   :  { %487 = shalt.err (!%p484_p3)
}
 0x210   :  { %s502_s30 = smov 128   ;;  %s503_s4 = smov 8  }
 0x211   :  { %291 = dma.vmem_to_hbm [thread:$0]  %s286_s21, 256, %s591_s3, [#allocation4], %s502_s30, %s502_s30, %s503_s4  }
 0x212   :  { %492 = dma.done.wait [#allocation4], 256  }
 0x213   :  { %493 = vsyncadd [#allocation4], 4294967040 }
 0x214   :  { %295 = vsyncpa [#allocation3], 1 }
 0x215   :  { %296 = vsyncpa [#allocation6], 1 }
 0x216   :  { %297 = vsyncpa [#allocation4], 1 }

</bundles_post_ra>
